<compile_context>
chip_gen: v5e
topology: v5e:2x2
jax: 0.10.0
libtpu: 0.0.40
codegen_flags: <defaults>
</compile_context>

<pallas_src>
import jax
import jax.numpy as jnp
from jax.experimental import pallas as pl
from jax.experimental.pallas import tpu as pltpu


def _linear_sigmoid_kernel(x_ref, w_ref, b_ref, o_ref):
    # x_ref: (tile_b, K) VMEM   w_ref: (1, K) VMEM   b_ref: (1,) SMEM
    # o_ref: (tile_b, 1) VMEM
    x = x_ref[...].astype(jnp.float32)                    # (tile_b, K)
    w = w_ref[...].astype(jnp.float32)                    # (1, K) -> broadcast
    acc = jnp.sum(x * w, axis=-1, keepdims=True)          # VPU mul + XLU reduce, f32
    acc = acc + b_ref[0]                                  # scalar bias from SMEM
    o_ref[...] = jax.nn.sigmoid(acc).astype(o_ref.dtype)  # EUP exp epilogue


def _round_up(v, m):
    return ((v + m - 1) // m) * m


def linear_sigmoid(x, weight, bias, *, tile_b=2048):
    """sigmoid(x @ weight.T + bias).  x: (B, K), weight: (1, K), bias: (1,)."""
    B, K = x.shape
    assert weight.shape == (1, K), weight.shape
    assert bias.shape == (1,), bias.shape

    # Batch tile: multiple of 8 (f32 sublane), no larger than the (rounded) batch.
    tile_b = max(8, min(_round_up(tile_b, 8), _round_up(B, 8)))
    grid_b = pl.cdiv(B, tile_b)
    # Large batch but too few grid steps: rebalance so the "parallel" axis has
    # >=4 steps (lets v7x's 2 TensorCores split the work, keeps the pipeline deep).
    if grid_b < 4 and B >= 4 * 1024:
        tile_b = max(1024, _round_up(pl.cdiv(B, 4), 8))
        grid_b = pl.cdiv(B, tile_b)

    b = bias.astype(jnp.float32)  # (1,) scalar, lives in SMEM; added in f32

    itemsize = x.dtype.itemsize
    cost = pl.CostEstimate(
        flops=2 * B * K,
        transcendentals=B,
        bytes_accessed=B * K * itemsize + K * weight.dtype.itemsize + B * itemsize + 4,
    )

    out = pl.pallas_call(
        _linear_sigmoid_kernel,
        out_shape=jax.ShapeDtypeStruct((B, 1), x.dtype),
        grid=(grid_b,),
        in_specs=[
            pl.BlockSpec((tile_b, K), lambda i: (i, 0)),        # x: batch-tiled, lane-dense
            pl.BlockSpec((1, K), lambda i: (0, 0)),             # weight row: grid-resident
            pl.BlockSpec(memory_space=pltpu.MemorySpace.SMEM),  # bias scalar in SMEM
        ],
        out_specs=pl.BlockSpec((tile_b, 1), lambda i: (i, 0)),
        compiler_params=pltpu.CompilerParams(
            dimension_semantics=("parallel",),  # megacore / v7x 2-TC batch split
        ),
        cost_estimate=cost,
    )(x, weight, b)

    return out


if __name__ == "__main__":
    key = jax.random.PRNGKey(0)
    kx, kw, kb = jax.random.split(key, 3)

    B, K = 24, 512  # hidden=512 per the module; small batch for the demo
    x = jax.random.normal(kx, (B, K), dtype=jnp.float32)
    weight = jax.random.normal(kw, (1, K), dtype=jnp.float32) * (1.0 / (K ** 0.5))
    bias = jax.random.normal(kb, (1,), dtype=jnp.float32)

    # Reference in pure elementwise f32 (identical math to x @ weight.T + bias).
    ref = jax.nn.sigmoid(jnp.sum(x * weight, axis=-1, keepdims=True) + bias)

    # Default tiling (single block) and a small tile that exercises a
    # multi-step grid with a ragged, masked final block (24 = 16 + 8).
    for tb in (2048, 16):
        y = linear_sigmoid(x, weight, bias, tile_b=tb)
        jax.block_until_ready(y)
        assert y.shape == (B, 1), (y.shape, (B, 1))
        assert y.dtype == x.dtype, (y.dtype, x.dtype)
        assert jnp.allclose(y, ref, atol=1e-4, rtol=1e-4), float(jnp.max(jnp.abs(y - ref)))

    print("KERNEL_OK")
</pallas_src>

<mosaic_0001>
module attributes {stable_mosaic.version = 11 : i64} {
  func.func @_linear_sigmoid_kernel(%arg0: i32, %arg1: memref<24x512xf32, #tpu.memory_space<vmem>>, %arg2: memref<1x512xf32, #tpu.memory_space<vmem>>, %arg3: memref<1xf32, #tpu.memory_space<smem>>, %arg4: memref<24x1xf32, #tpu.memory_space<vmem>>) attributes {dimension_semantics = [#tpu.dimension_semantics<parallel>], iteration_bounds = array<i64: 1>, scalar_prefetch = 0 : i64, scratch_operands = 0 : i64, tpu.core_type = #tpu.core_type<tc>, window_params = [{transform_indices = @transform_0, window_bounds = array<i64: 24, 512>}, {pipeline_mode = #tpu.pipeline_mode<synchronous>, transform_indices = @transform_1, window_bounds = array<i64: 1, 512>}, {transform_indices = @transform_2, window_bounds = array<i64: 1>}, {transform_indices = @transform_3, window_bounds = array<i64: 24, 1>}]} {
    %c0 = arith.constant 0 : index
    %c0_0 = arith.constant 0 : index
    %0 = vector.load %arg1[%c0, %c0_0] : memref<24x512xf32, #tpu.memory_space<vmem>>, vector<24x512xf32>
    %c0_1 = arith.constant 0 : index
    %c0_2 = arith.constant 0 : index
    %1 = vector.load %arg2[%c0_1, %c0_2] : memref<1x512xf32, #tpu.memory_space<vmem>>, vector<1x512xf32>
    %2 = vector.broadcast %1 : vector<1x512xf32> to vector<24x512xf32>
    %3 = arith.mulf %0, %2 : vector<24x512xf32>
    %cst = arith.constant dense<0.000000e+00> : vector<24xf32>
    %4 = vector.multi_reduction <add>, %3, %cst [1] : vector<24x512xf32> to vector<24xf32>
    %5 = vector.shape_cast %4 : vector<24xf32> to vector<24x1xf32>
    %c0_3 = arith.constant 0 : index
    %6 = memref.load %arg3[%c0_3] : memref<1xf32, #tpu.memory_space<smem>>
    %7 = vector.broadcast %6 : f32 to vector<24x1xf32>
    %8 = arith.addf %5, %7 : vector<24x1xf32>
    %9 = arith.negf %8 : vector<24x1xf32>
    %10 = math.exp %9 : vector<24x1xf32>
    %cst_4 = arith.constant 1.000000e+00 : f32
    %11 = vector.broadcast %cst_4 : f32 to vector<24x1xf32>
    %12 = arith.addf %11, %10 : vector<24x1xf32>
    %13 = arith.divf %11, %12 : vector<24x1xf32>
    %c0_5 = arith.constant 0 : index
    %c0_6 = arith.constant 0 : index
    %14 = vector.load %arg4[%c0_5, %c0_6] : memref<24x1xf32, #tpu.memory_space<vmem>>, vector<24x1xf32>
    tpu.vector_store %arg4[%c0_5, %c0_6], %13 {strides = array<i32>} : memref<24x1xf32, #tpu.memory_space<vmem>>, vector<24x1xf32>,
    return
  }
  func.func @transform_0(%arg0: i32) -> (i32, i32) {
    %c0_i32 = arith.constant 0 : i32
    %c0_i32_0 = arith.constant 0 : i32
    return %arg0, %c0_i32 : i32, i32
  }
  func.func @transform_1(%arg0: i32) -> (i32, i32) {
    %c0_i32 = arith.constant 0 : i32
    %c0_i32_0 = arith.constant 0 : i32
    %c0_i32_1 = arith.constant 0 : i32
    return %c0_i32, %c0_i32_0 : i32, i32
  }
  func.func @transform_2(%arg0: i32) -> i32 {
    %c0_i32 = arith.constant 0 : i32
    %c0_i32_0 = arith.constant 0 : i32
    return %c0_i32 : i32
  }
  func.func @transform_3(%arg0: i32) -> (i32, i32) {
    %c0_i32 = arith.constant 0 : i32
    %c0_i32_0 = arith.constant 0 : i32
    return %arg0, %c0_i32 : i32, i32
  }
}

</mosaic_0001>

<bundles_post_ra>
// kernel: tpu_custom_call.1
= control target key start
LH: loop header
LB: loop body
LE: loop exit
PB: predicated region body
PF: predicated region fallthrough
CT: control target
= control target key end

     0   :  { %9 = vsyncpa [#allocation4], 0  ;;  %s282_s0 = inlined_call_operand.hbm [shape: f32[24,512], index: 0, kind: input, shape index: {}]   ;;  %s283_s1 = inlined_call_operand.hbm [shape: f32[1,512], index: 1, kind: input, shape index: {}]   ;;  %s284_s2 = inlined_call_operand.<no memory space> [shape: f32[1], index: 2, kind: input, shape index: {}]   ;;  %s285_s3 = inlined_call_operand.vmem [shape: f32[24,1], index: 3, kind: output, shape index: {}]  }
   0x1   :  { %s15_s14 = sshll.u32 %s282_s0, 4  ;;  %s16_s14 = int_to_ptr.hbm [resolvable:$true] %s15_s14 }
   0x2   :  { %10 = vsyncpa [#allocation6], 0  ;;  %s237_s15 = smov [#allocation3]   ;;  %s29_s19 = sshll.u32 %s283_s1, 4  ;;  %s30_s19 = int_to_ptr.hbm [resolvable:$true] %s29_s19 }
   0x3   :  { %s17_s16 = sshll.u32 %s237_s15, 4  ;;  %s238_s20 = smov 512   ;;  %s18_s16 = int_to_ptr.vmem [resolvable:$true] %s17_s16 }
   0x4   :  { %s239_s21 = smov 32   ;;  %s240_s22 = smov [#allocation5]  }
   0x5   :  { %23 = dma.hbm_to_vmem [thread:$0]  %s16_s14, 1536, %s18_s16, [#allocation4], %s238_s20, %s238_s20, %s239_s21  }
   0x6   :  { %s31_s23 = sshll.u32 %s240_s22, 4  ;;  %s32_s23 = int_to_ptr.vmem [resolvable:$true] %s31_s23 }
   0x7   :  { %34 = dma.hbm_to_vmem [thread:$0]  %s30_s19, 64, %s32_s23, [#allocation6]  }
   0x8   :  { %233 = dma.done.wait [#allocation4], 1536  }
   0x9   :  { %234 = vsyncadd [#allocation4], 4294965760 }
   0xa   :  { %235 = dma.done.wait [#allocation6], 64  }
   0xb   :  { %236 = vsyncadd [#allocation6], 4294967232  ;;  %v53_v0 = vld [vmem:[#allocation3 + $0x40] sm:$0xff]  ;;  %v54_v1 = vld [vmem:[#allocation3 + $0x48] sm:$0xff]  ;;  %v95_v38 = vstv %s284_s2  ;;  %vm156_vm3 = vcmask 7168  }
   0xc   :  { %v55_v2 = vld [vmem:[#allocation3 + $0x50] sm:$0xff]  ;;  %v57_v3 = vld [vmem:[#allocation5] sm:$0xf]  ;;  %v46_v9 = vld [vmem:[#allocation3 + $0x8] sm:$0xff] }
   0xd   :  { %v45_v4 = vld [vmem:[#allocation3] sm:$0xff]  ;;  %v59_v5 = vperm.slane %v57_v3, 0  ;;  %v60_v6 = vperm.slane %v57_v3, 1  ;;  %v61_v7 = vperm.slane %v57_v3, 2  ;;  %v62_v8 = vperm.slane %v57_v3, 3  ;;  %v47_v10 = vld [vmem:[#allocation3 + $0x10] sm:$0xff] }
   0xe   :  { %v56_v11 = vld [vmem:[#allocation3 + $0x58] sm:$0xff]  ;;  %v49_v12 = vld [vmem:[#allocation3 + $0x20] sm:$0xff]  ;;  %v50_v13 = vld [vmem:[#allocation3 + $0x28] sm:$0xff] }
   0xf   :  { %v75_v14 = vmul.f32 %v59_v5, %v53_v0  ;;  %v76_v15 = vmul.f32 %v60_v6, %v54_v1  ;;  %v77_v16 = vmul.f32 %v61_v7, %v55_v2  ;;  %v48_v17 = vld [vmem:[#allocation3 + $0x18] sm:$0xff]  ;;  %v67_v18 = vmul.f32 %v59_v5, %v45_v4  ;;  %v51_v23 = vld [vmem:[#allocation3 + $0x30] sm:$0xff] }
  0x10   :  { %v68_v19 = vmul.f32 %v60_v6, %v46_v9  ;;  %v69_v20 = vmul.f32 %v61_v7, %v47_v10  ;;  %v78_v21 = vmul.f32 %v62_v8, %v56_v11  ;;  %v71_v24 = vmul.f32 %v59_v5, %v49_v12  ;;  %v52_v33 = vld [vmem:[#allocation3 + $0x38] sm:$0xff] }
  0x11   :  { %v89_v22 = vadd.f32 %v76_v15, %v75_v14  ;;  %v72_v25 = vmul.f32 %v60_v6, %v50_v13  ;;  %v70_v26 = vmul.f32 %v62_v8, %v48_v17  ;;  %v73_v30 = vmul.f32 %v61_v7, %v51_v23 }
  0x12   :  { %v79_v27 = vadd.f32 %v68_v19, %v67_v18  ;;  %v74_v35 = vmul.f32 %v62_v8, %v52_v33 }
  0x13   :  { %v90_v28 = vadd.f32 %v89_v22, %v77_v16  ;;  %v84_v31 = vadd.f32 %v72_v25, %v71_v24 }
  0x14   :  { %v80_v29 = vadd.f32 %v79_v27, %v69_v20 }
  0x15   :  { %v91_v32 = vadd.f32 %v90_v28, %v78_v21  ;;  %v85_v36 = vadd.f32 %v84_v31, %v73_v30 }
  0x16   :  { %v81_v34 = vadd.f32 %v80_v29, %v70_v26 }
  0x17   :  { %92 = vadd.xlane.f32.xlu1 %v91_v32  ;;  %v86_v37 = vadd.f32 %v85_v36, %v74_v35 }
  0x18   :  { %82 = vadd.xlane.f32.xlu0 %v81_v34 }
  0x20   :  { %87 = vadd.xlane.f32.xlu0 %v86_v37 }
  0x8a   :  { %v93_v39 = vpop.xlane.xlu1 %92 }
  0x8b   :  { %v98_v40 = vadd.f32 %v95_v38, %v93_v39  ;;  %v83_v41 = vpop.xlane.xlu0 %82 }
  0x8c   :  { %v96_v42 = vadd.f32 %v95_v38, %v83_v41 }
  0x8d   :  { %v168_v43 = vmul.f32 -1.442695, %v98_v40 }
  0x8e   :  { %v166_v44 = vmul.f32 -1.442695, %v96_v42 }
  0x8f   :  { %173 = vpow2.f32 %v168_v43 }
  0x90   :  { %175 = vpow2.f32 %v166_v44 }
  0x93   :  { %v88_v45 = vpop.xlane.xlu0 %87 }
  0x94   :  { %v97_v46 = vadd.f32 %v95_v38, %v88_v45 }
  0x95   :  { %v174_v47 = vpop.eup %173 }
  0x96   :  { %v176_v48 = vpop.eup %175  ;;  %v110_v49 = vadd.f32 1.0, %v174_v47  ;;  %v167_v50 = vmul.f32 -1.442695, %v97_v46 }
  0x97   :  { %v108_v51 = vadd.f32 1.0, %v176_v48 }
  0x98   :  { %177 = vrcp.f32 %v110_v49  ;;  %vm146_vm0 = vweird.f32 %v110_v49  ;;  %v150_v59 = vand.u32 2147483647, %v110_v49  ;;  %v152_v60 = vand.u32 2147483648, %v110_v49 }
  0x99   :  { %179 = vrcp.f32 %v108_v51  ;;  %v122_v63 = vand.u32 2147483648, %v108_v51  ;;  %v120_v1 = vand.u32 2147483647, %v108_v51  ;;  %vm116_vm5 = vweird.f32 %v108_v51 }
  0x9a   :  { %181 = vpow2.f32 %v167_v50  ;;  %v153_v3 = vor.u32 1.1754944e-38, %v152_v60  ;;  %vm151_vm6 = vcmp.eq.f32.partialorder %v150_v59, 8.507059e+37 }
  0x9b   :  { %v123_v6 = vor.u32 1.1754944e-38, %v122_v63  ;;  %vm121_vm8 = vcmp.eq.f32.partialorder %v120_v1, 8.507059e+37 }
  0x9e   :  { %v178_v52 = vpop.eup %177 }
  0x9f   :  { %v180_v53 = vpop.eup %179  ;;  %v142_v54 = vmul.f32 %v178_v52, %v110_v49  ;;  %vm147_vm1 = vweird.f32 %v178_v52 }
  0xa0   :  { %v182_v55 = vpop.eup %181  ;;  %v112_v56 = vmul.f32 %v180_v53, %v108_v51  ;;  %vm117_vm2 = vweird.f32 %v180_v53  ;;  %vm148_vm4 = vmor %vm146_vm0, %vm147_vm1 }
  0xa1   :  { %v143_v57 = vsub.f32 1.0, %v142_v54  ;;  %v109_v58 = vadd.f32 1.0, %v182_v55  ;;  %vm118_vm7 = vmor %vm116_vm5, %vm117_vm2 }
  0xa2   :  { %v113_v61 = vsub.f32 1.0, %v112_v56 }
  0xa3   :  { %v144_v62 = vmul.f32 %v178_v52, %v143_v57  ;;  %183 = vrcp.f32 %v109_v58  ;;  %v137_v13 = vand.u32 2147483648, %v109_v58  ;;  %v135_v15 = vand.u32 2147483647, %v109_v58 }
  0xa4   :  { %v114_v0 = vmul.f32 %v180_v53, %v113_v61  ;;  %vm131_vm10 = vweird.f32 %v109_v58 }
  0xa5   :  { %v145_v2 = vadd.f32 %v178_v52, %v144_v62  ;;  %v138_v17 = vor.u32 1.1754944e-38, %v137_v13  ;;  %vm136_vm12 = vcmp.eq.f32.partialorder %v135_v15, 8.507059e+37 }
  0xa6   :  { %v115_v4 = vadd.f32 %v180_v53, %v114_v0 }
  0xa7   :  { %v149_v5 = vsel %vm148_vm4, %v178_v52, %v145_v2 }
  0xa8   :  { %v154_v7 = vsel %vm151_vm6, %v153_v3, %v149_v5  ;;  %v119_v8 = vsel %vm118_vm7, %v180_v53, %v115_v4 }
  0xa9   :  { %v184_v9 = vpop.eup %183  ;;  %159 = vst.msk [vmem:[%s285_s3 + $0x10] sm:$0xff] %vm156_vm3, %v154_v7  ;;  %v124_v10 = vsel %vm121_vm8, %v123_v6, %v119_v8 }
  0xaa   :  { %157 = vst.msk [vmem:[%s285_s3] sm:$0xff] %vm156_vm3, %v124_v10  ;;  %v127_v11 = vmul.f32 %v184_v9, %v109_v58  ;;  %vm132_vm9 = vweird.f32 %v184_v9 }
  0xab   :  { %vm133_vm11 = vmor %vm131_vm10, %vm132_vm9 }
  0xac   :  { %v128_v12 = vsub.f32 1.0, %v127_v11 }
  0xae   :  { %v129_v14 = vmul.f32 %v184_v9, %v128_v12 }
  0xb0   :  { %v130_v16 = vadd.f32 %v184_v9, %v129_v14 }
  0xb2   :  { %v134_v18 = vsel %vm133_vm11, %v184_v9, %v130_v16 }
  0xb3   :  { %v139_v19 = vsel %vm136_vm12, %v138_v17, %v134_v18 }
  0xb4   :  { %158 = vst.msk [vmem:[%s285_s3 + $0x8] sm:$0xff] %vm156_vm3, %v139_v19 }
  0xb5   :  { %164 = vsyncpa [#allocation4], 1 }
  0xb6   :  { %165 = vsyncpa [#allocation6], 1 }

</bundles_post_ra>
